<compile_context>
chip_gen: v7x
topology: tpu7x:2x2x1
jax: 0.10.0
libtpu: 0.0.40
codegen_flags: <defaults>
</compile_context>

<pallas_src>
import functools

import jax
import jax.numpy as jnp
from jax.experimental import pallas as pl
from jax.experimental.pallas import tpu as pltpu


_VMEM_BUDGET = 40 * 1024 * 1024   # target working set (double-buffered)
_VMEM_LIMIT = 48 * 1024 * 1024    # scoped VMEM limit handed to Mosaic


def _cdiv(a, b):
    return -(-a // b)


def _round_up(x, m):
    return ((x + m - 1) // m) * m


def _num_tensorcores():
    """Best-effort detection of per-chip TensorCore count (v7x has 2)."""
    try:
        kind = jax.devices()[0].device_kind.lower()
    except Exception:  # pragma: no cover - defensive
        return 1
    if "v7" in kind or "tpu7" in kind or "7x" in kind:
        return 2
    return 1


def _plan_tiles(B, D, Kpad, x_itemsize, min_batch_blocks):
    """Pick (TB, TD) bounding padding waste and the VMEM working set."""
    TB_MAX, TD_MAX = 1024, 8192

    nb = _cdiv(B, TB_MAX)
    if min_batch_blocks > 1 and B >= 16 * min_batch_blocks:
        # v7x: make sure both TensorCores get at least one batch block.
        nb = max(nb, min_batch_blocks)
    TB = _round_up(_cdiv(B, nb), 8)

    nk = _cdiv(D, TD_MAX)
    TD = _round_up(_cdiv(D, nk), 128)

    def vmem_bytes(tb, td):
        # double-buffered x (stream dtype) + W (bf16) + out (f32) + f32 acc
        return (2 * tb * td * x_itemsize
                + 2 * td * Kpad * 2
                + 2 * tb * Kpad * 4
                + tb * Kpad * 4)

    while vmem_bytes(TB, TD) > _VMEM_BUDGET and TD > 512:
        TD = max(512, _round_up(TD // 2, 128))
    while vmem_bytes(TB, TD) > _VMEM_BUDGET and TB > 256:
        TB = max(256, _round_up(TB // 2, 8))
    return TB, TD


def _energy_kernel(x_ref, w_ref, b_ref, out_ref, acc_ref, *, energy_col):
    # x_ref: (TB, TD) input dtype (cast to bf16 here), w_ref: (TD, Kpad) bf16,
    # b_ref: (1, Kpad) f32, out_ref: (TB, Kpad) f32
    #   (cols [:K] = logits, col K = energy = -logsumexp)
    # acc_ref: (TB, Kpad) f32 scratch accumulator, resident across the D axis.
    k = pl.program_id(1)

    prod = jnp.dot(
        x_ref[...].astype(jnp.bfloat16),
        w_ref[...],
        preferred_element_type=jnp.float32,
    )

    @pl.when(k == 0)
    def _init():
        acc_ref[...] = prod

    @pl.when(k > 0)
    def _accumulate():
        acc_ref[...] += prod

    @pl.when(k == pl.num_programs(1) - 1)
    def _finalize():
        logits = acc_ref[...] + b_ref[...]      # padded cols carry -1e30 bias
        m = jnp.max(logits, axis=1, keepdims=True)
        lse = m + jnp.log(jnp.sum(jnp.exp(logits - m), axis=1, keepdims=True))
        col = jax.lax.broadcasted_iota(jnp.int32, logits.shape, 1)
        # single lane-dense store: logits in cols < K, energy in col == K
        out_ref[...] = jnp.where(col == energy_col, -lse, logits).astype(
            out_ref.dtype
        )


def energy_model_forward(x_nchw, w, b, y=None):
    """EnergyModel.forward.

    Returns:
      y is None:  (-logsumexp(logits, 1)  [B],    logits [B, K])
      y given:    (-gather(logits, 1, y[:, None]) [B, 1], logits [B, K])
    """
    B = int(x_nchw.shape[0])
    D = 1
    for s in x_nchw.shape[1:]:
        D *= int(s)
    K = int(w.shape[1])

    # ---- tile / padding plan -------------------------------------------------
    Kpad = _round_up(K + 1, 128)          # +1 spare column for the energy store
    x_item = jnp.dtype(x_nchw.dtype).itemsize
    TB, TD = _plan_tiles(B, D, Kpad, x_item, _num_tensorcores())
    Bpad = _round_up(B, TB)
    Dpad = _round_up(D, TD)

    # x: stream in its incoming dtype; pad only if the tile plan requires it.
    x_flat = x_nchw.reshape(B, D)
    if (Bpad, Dpad) != (B, D):
        x_flat = jnp.pad(x_flat, ((0, Bpad - B), (0, Dpad - D)))
    # W: small, re-streamed per batch tile -> one-time bf16 cast in the wrapper.
    w_p = jnp.pad(w.astype(jnp.bfloat16), ((0, Dpad - D), (0, Kpad - K)))
    b_p = jnp.concatenate(
        [b.astype(jnp.float32), jnp.full((Kpad - K,), -1e30, jnp.float32)]
    ).reshape(1, Kpad)

    grid = (Bpad // TB, Dpad // TD)

    out_padded = pl.pallas_call(
        functools.partial(_energy_kernel, energy_col=K),
        out_shape=jax.ShapeDtypeStruct((Bpad, Kpad), jnp.float32),
        grid_spec=pltpu.PrefetchScalarGridSpec(
            num_scalar_prefetch=0,
            grid=grid,
            in_specs=[
                pl.BlockSpec((TB, TD), lambda i, k: (i, k)),     # x tile
                pl.BlockSpec((TD, Kpad), lambda i, k: (k, 0)),   # W tile
                pl.BlockSpec((1, Kpad), lambda i, k: (0, 0)),    # bias
            ],
            out_specs=pl.BlockSpec((TB, Kpad), lambda i, k: (i, 0)),
            scratch_shapes=[pltpu.VMEM((TB, Kpad), jnp.float32)],
        ),
        compiler_params=pltpu.CompilerParams(
            dimension_semantics=("parallel", "arbitrary"),
            vmem_limit_bytes=_VMEM_LIMIT,
        ),
        cost_estimate=pl.CostEstimate(
            flops=2 * Bpad * Dpad * Kpad,
            transcendentals=Bpad * Kpad,
            bytes_accessed=(
                Bpad * Dpad * x_item                       # x read once
                + (Bpad // TB) * Dpad * Kpad * 2           # W per batch tile
                + Bpad * Kpad * 4                          # output write
                + Kpad * 4                                 # bias
            ),
        ),
    )(x_flat, w_p, b_p)

    logits = out_padded[:B, :K]
    if y is None:
        energy = out_padded[:B, K]          # -logsumexp, shape [B]
        return energy, logits
    # label-energy branch: -torch.gather(logits, 1, y[:, None]); tiny [B, K]
    # gather — cheapest as a single XLA op on the already-computed logits.
    gathered = jnp.take_along_axis(logits, y[:, None].astype(jnp.int32), axis=1)
    return -gathered, logits


if __name__ == "__main__":
    key = jax.random.PRNGKey(0)
    kx, kw, kb, ky = jax.random.split(key, 4)

    B, C, H, W = 2, 4, 16, 16
    D = C * H * W
    K = 10  # number of classes

    x = jax.random.normal(kx, (B, C, H, W), dtype=jnp.float32)
    w = jax.random.normal(kw, (D, K), dtype=jnp.float32) * 0.02
    b = jax.random.normal(kb, (K,), dtype=jnp.float32) * 0.01
    y = jax.random.randint(ky, (B,), 0, K, dtype=jnp.int32)

    # ---- y is None branch: (-logsumexp(logits, 1), logits) -------------------
    energy, logits = energy_model_forward(x, w, b, y=None)
    jax.block_until_ready(energy)
    jax.block_until_ready(logits)

    # reference (plain JAX) against the same bf16-rounded operands
    xq = x.reshape(B, D).astype(jnp.bfloat16).astype(jnp.float32)
    wq = w.astype(jnp.bfloat16).astype(jnp.float32)
    ref_logits = xq @ wq + b
    ref_energy = -jax.scipy.special.logsumexp(ref_logits, axis=1)
    assert logits.shape == (B, K)
    assert energy.shape == (B,)
    assert jnp.allclose(logits, ref_logits, atol=5e-3, rtol=5e-3)
    assert jnp.allclose(energy, ref_energy, atol=5e-3, rtol=5e-3)

    # ---- y-given branch: (-gather(logits, 1, y[:, None]), logits) ------------
    energy_y, logits_y = energy_model_forward(x, w, b, y=y)
    jax.block_until_ready(energy_y)
    ref_energy_y = -jnp.take_along_axis(ref_logits, y[:, None], axis=1)
    assert energy_y.shape == (B, 1)
    assert jnp.allclose(logits_y, ref_logits, atol=5e-3, rtol=5e-3)
    assert jnp.allclose(energy_y, ref_energy_y, atol=5e-3, rtol=5e-3)

    print("KERNEL_OK")
</pallas_src>

<mosaic_0001>
module attributes {stable_mosaic.version = 11 : i64} {
  func.func @_energy_kernel(%arg0: i32, %arg1: i32, %arg2: memref<8x1024xf32, #tpu.memory_space<vmem>>, %arg3: memref<1024x128xbf16, #tpu.memory_space<vmem>>, %arg4: memref<1x128xf32, #tpu.memory_space<vmem>>, %arg5: memref<8x128xf32, #tpu.memory_space<vmem>>, %arg6: memref<8x128xf32, #tpu.memory_space<vmem>>) attributes {dimension_semantics = [#tpu.dimension_semantics<parallel>, #tpu.dimension_semantics<arbitrary>], iteration_bounds = array<i64: 1, 1>, scalar_prefetch = 0 : i64, scratch_operands = 1 : i64, tpu.core_type = #tpu.core_type<tc>, window_params = [{transform_indices = @transform_0, window_bounds = array<i64: 8, 1024>}, {transform_indices = @transform_1, window_bounds = array<i64: 1024, 128>}, {pipeline_mode = #tpu.pipeline_mode<synchronous>, transform_indices = @transform_2, window_bounds = array<i64: 1, 128>}, {transform_indices = @transform_3, window_bounds = array<i64: 8, 128>}]} {
    %c0 = arith.constant 0 : index
    %c0_0 = arith.constant 0 : index
    %0 = vector.load %arg2[%c0, %c0_0] : memref<8x1024xf32, #tpu.memory_space<vmem>>, vector<8x1024xf32>
    %1 = arith.truncf %0 : vector<8x1024xf32> to vector<8x1024xbf16>
    %c0_1 = arith.constant 0 : index
    %c0_2 = arith.constant 0 : index
    %2 = vector.load %arg3[%c0_1, %c0_2] : memref<1024x128xbf16, #tpu.memory_space<vmem>>, vector<1024x128xbf16>
    %cst = arith.constant dense<0.000000e+00> : vector<8x128xf32>
    %3 = tpu.matmul %1, %2, %cst {dimension_numbers = #tpu.dot_dimension_numbers<[1], [0], [0], [1], [0, 0, 1, 1], [], []>} : vector<8x1024xbf16>, vector<1024x128xbf16>, vector<8x128xf32> -> vector<8x128xf32>
    %c0_i32 = arith.constant 0 : i32
    %4 = arith.cmpi eq, %arg1, %c0_i32 : i32
    %5 = arith.extui %4 : i1 to i32
    %c0_i32_3 = arith.constant 0 : i32
    %6 = arith.cmpi ne, %5, %c0_i32_3 : i32
    scf.if %6 {
      %c0_8 = arith.constant 0 : index
      %c0_9 = arith.constant 0 : index
      %13 = vector.load %arg6[%c0_8, %c0_9] : memref<8x128xf32, #tpu.memory_space<vmem>>, vector<8x128xf32>
      tpu.vector_store %arg6[%c0_8, %c0_9], %3 {strides = array<i32>} : memref<8x128xf32, #tpu.memory_space<vmem>>, vector<8x128xf32>,
    } else {
    }
    %c0_i32_4 = arith.constant 0 : i32
    %7 = arith.cmpi sgt, %arg1, %c0_i32_4 : i32
    %8 = arith.extui %7 : i1 to i32
    %c0_i32_5 = arith.constant 0 : i32
    %9 = arith.cmpi ne, %8, %c0_i32_5 : i32
    scf.if %9 {
      %c0_8 = arith.constant 0 : index
      %c0_9 = arith.constant 0 : index
      %13 = vector.load %arg6[%c0_8, %c0_9] : memref<8x128xf32, #tpu.memory_space<vmem>>, vector<8x128xf32>
      %14 = arith.addf %13, %3 : vector<8x128xf32>
      %c0_10 = arith.constant 0 : index
      %c0_11 = arith.constant 0 : index
      %15 = vector.load %arg6[%c0_10, %c0_11] : memref<8x128xf32, #tpu.memory_space<vmem>>, vector<8x128xf32>
      tpu.vector_store %arg6[%c0_10, %c0_11], %14 {strides = array<i32>} : memref<8x128xf32, #tpu.memory_space<vmem>>, vector<8x128xf32>,
    } else {
    }
    %c0_i32_6 = arith.constant 0 : i32
    %10 = arith.cmpi eq, %arg1, %c0_i32_6 : i32
    %11 = arith.extui %10 : i1 to i32
    %c0_i32_7 = arith.constant 0 : i32
    %12 = arith.cmpi ne, %11, %c0_i32_7 : i32
    scf.if %12 {
      %c0_8 = arith.constant 0 : index
      %c0_9 = arith.constant 0 : index
      %13 = vector.load %arg6[%c0_8, %c0_9] : memref<8x128xf32, #tpu.memory_space<vmem>>, vector<8x128xf32>
      %c0_10 = arith.constant 0 : index
      %c0_11 = arith.constant 0 : index
      %14 = vector.load %arg4[%c0_10, %c0_11] : memref<1x128xf32, #tpu.memory_space<vmem>>, vector<1x128xf32>
      %15 = vector.broadcast %14 : vector<1x128xf32> to vector<8x128xf32>
      %16 = arith.addf %13, %15 : vector<8x128xf32>
      %cst_12 = arith.constant dense<0xFF800000> : vector<8xf32>
      %17 = vector.multi_reduction <maximumf>, %16, %cst_12 [1] : vector<8x128xf32> to vector<8xf32>
      %18 = vector.shape_cast %17 : vector<8xf32> to vector<8x1xf32>
      %19 = vector.broadcast %18 : vector<8x1xf32> to vector<8x128xf32>
      %20 = arith.subf %16, %19 : vector<8x128xf32>
      %21 = math.exp %20 : vector<8x128xf32>
      %cst_13 = arith.constant dense<0.000000e+00> : vector<8xf32>
      %22 = vector.multi_reduction <add>, %21, %cst_13 [1] : vector<8x128xf32> to vector<8xf32>
      %23 = vector.shape_cast %22 : vector<8xf32> to vector<8x1xf32>
      %24 = math.log %23 : vector<8x1xf32>
      %25 = arith.addf %18, %24 : vector<8x1xf32>
      %26 = tpu.iota {dimensions = array<i32: 1>} : vector<8x128xi32>
      %c10_i32 = arith.constant 10 : i32
      %27 = vector.broadcast %c10_i32 : i32 to vector<8x128xi32>
      %28 = arith.cmpi eq, %26, %27 : vector<8x128xi32>
      %cst_14 = arith.constant 0.000000e+00 : f32
      %29 = vector.broadcast %cst_14 : f32 to vector<8x1xf32>
      %30 = arith.subf %29, %25 : vector<8x1xf32>
      %31 = vector.shape_cast %30 : vector<8x1xf32> to vector<8x1xf32>
      %32 = vector.broadcast %31 : vector<8x1xf32> to vector<8x128xf32>
      %33 = arith.select %28, %32, %16 : vector<8x128xi1>, vector<8x128xf32>
      %c0_15 = arith.constant 0 : index
      %c0_16 = arith.constant 0 : index
      %34 = vector.load %arg5[%c0_15, %c0_16] : memref<8x128xf32, #tpu.memory_space<vmem>>, vector<8x128xf32>
      tpu.vector_store %arg5[%c0_15, %c0_16], %33 {strides = array<i32>} : memref<8x128xf32, #tpu.memory_space<vmem>>, vector<8x128xf32>,
    } else {
    }
    return
  }
  func.func @transform_0(%arg0: i32, %arg1: i32) -> (i32, i32) {
    %c0_i32 = arith.constant 0 : i32
    return %arg0, %arg1 : i32, i32
  }
  func.func @transform_1(%arg0: i32, %arg1: i32) -> (i32, i32) {
    %c0_i32 = arith.constant 0 : i32
    %c0_i32_0 = arith.constant 0 : i32
    return %arg1, %c0_i32 : i32, i32
  }
  func.func @transform_2(%arg0: i32, %arg1: i32) -> (i32, i32) {
    %c0_i32 = arith.constant 0 : i32
    %c0_i32_0 = arith.constant 0 : i32
    %c0_i32_1 = arith.constant 0 : i32
    return %c0_i32, %c0_i32_0 : i32, i32
  }
  func.func @transform_3(%arg0: i32, %arg1: i32) -> (i32, i32) {
    %c0_i32 = arith.constant 0 : i32
    %c0_i32_0 = arith.constant 0 : i32
    return %arg0, %c0_i32 : i32, i32
  }
}

</mosaic_0001>

<bundles_post_ra>
// kernel: tpu_custom_call.1
= control target key start
LH: loop header
LB: loop body
LE: loop exit
PB: predicated region body
PF: predicated region fallthrough
CT: control target
= control target key end

     0   :  { %8 = vsyncpa [#allocation4], 0  ;;  %s1155_s0 = inlined_call_operand.hbm [shape: f32[8,1024], index: 0, kind: input, shape index: {}]   ;;  %s1156_s1 = inlined_call_operand.hbm [shape: bf16[1024,128], index: 1, kind: input, shape index: {}]   ;;  %s1157_s2 = inlined_call_operand.vmem [shape: f32[1,128], index: 2, kind: input, shape index: {}]   ;;  %s1158_s3 = inlined_call_operand.hbm [shape: f32[8,128], index: 3, kind: output, shape index: {}]  }
   0x1   :  { %9 = vsyncpa [#allocation7], 0 }
   0x2   :  { %10 = vsyncpa [#allocation5], 0  ;;  %s1084_s12 = smov [#allocation3]   ;;  %s1085_s14 = smov [#allocation6]  }
   0x3   :  { %s17_s13 = sshll.u32 %s1084_s12, 4  ;;  %s26_s15 = sshll.u32 %s1085_s14, 4  ;;  %s18_s13 = int_to_ptr.vmem [resolvable:$true] %s17_s13  ;;  %s1109_s15 = int_to_ptr.vmem [resolvable:$true] %s26_s15 }
   0x4   :  { %s1012_s18 = scalar_lea.hbm %s1155_s0, 1024 }
   0x5   :  { %p1013_p0 = scmp.ne.s32.totalorder %s1155_s0, %s1012_s18  ;;  %p1016_p1 = scmp.lt.u32.totalorder %s1012_s18, %s1155_s0 }
   0x7   :  { %p1018_p2 = pnand %p1016_p1, %p1013_p0 }
   0x9   :  { %1021 = shalt.err (!%p1018_p2)
}
   0xa   :  { %s1022_s23 = scalar_lea.vmem %s18_s13, 1024  ;;  %p1027_p4 = scmp.lt.s32.totalorder %s18_s13, %s18_s13 }
   0xb   :  { %p1023_p3 = scmp.ne.s32.totalorder %s18_s13, %s1022_s23  ;;  %p1028_p5 = scmp.lt.s32.totalorder %s1022_s23, %s1022_s23 }
   0xd   :  { %p1029_p6 = por %p1028_p5, %p1027_p4 }
   0xf   :  { %p1030_p7 = pnand %p1029_p6, %p1023_p3 }
  0x11   :  { %1033 = shalt.err (!%p1030_p7)
}
  0x12   :  { %20 = dma.hbm_to_vmem [thread:$0]  %s1155_s0, 1024, %s18_s13, [#allocation4]  }
  0x13   :  { %s1034_s28 = scalar_lea.hbm %s1156_s1, 8192 }
  0x14   :  { %p1035_p8 = scmp.ne.s32.totalorder %s1156_s1, %s1034_s28  ;;  %p1038_p9 = scmp.lt.u32.totalorder %s1034_s28, %s1156_s1 }
  0x16   :  { %p1040_p10 = pnand %p1038_p9, %p1035_p8 }
  0x18   :  { %1043 = shalt.err (!%p1040_p10)
}
  0x19   :  { %s1044_s6 = scalar_lea.vmem %s1109_s15, 8192  ;;  %p1049_p12 = scmp.lt.s32.totalorder %s1109_s15, %s1109_s15 }
  0x1a   :  { %p1045_p11 = scmp.ne.s32.totalorder %s1109_s15, %s1044_s6  ;;  %p1050_p13 = scmp.lt.s32.totalorder %s1044_s6, %s1044_s6 }
  0x1c   :  { %p1051_p0 = por %p1050_p13, %p1049_p12 }
  0x1e   :  { %p1052_p1 = pnand %p1051_p0, %p1045_p11 }
  0x20   :  { %1055 = shalt.err (!%p1052_p1)
}
  0x21   :  { %s1086_s0 = smov 64   ;;  %s1087_s7 = smov 4  }
  0x22   :  { %32 = dma.hbm_to_vmem [thread:$0]  %s1156_s1, 8192, %s1109_s15, [#allocation7], %s1086_s0, %s1086_s0, %s1087_s7  }
  0x23   :  { %1078 = dma.done.wait [#allocation4], 1024  }
  0x24   :  { %1079 = vsyncadd [#allocation4], 4294966272 }
  0x25   :  { %1080 = dma.done.wait [#allocation7], 8192  }
  0x26   :  { %1081 = vsyncadd [#allocation7], 4294959104  ;;  %v944_v0 = vld [vmem:[#allocation6 + $0x40] sm:$0xff]   ;;  %v948_v4 = vld [vmem:[#allocation6 + $0x48] sm:$0xff]   ;;  %s1088_s11 = smov [#allocation8]  }
  0x27   :  { %v945_v1 = vld [vmem:[#allocation6 + $0xc0] sm:$0xff]   ;;  %851 = vmatprep.subr.bf16.mxu0 %v944_v0  ;;  %v949_v5 = vld [vmem:[#allocation6 + $0xc8] sm:$0xff]   ;;  %v952_v8 = vld [vmem:[#allocation6 + $0x50] sm:$0xff]   ;;  %s776_s12 = sshll.u32 %s1088_s11, 4  ;;  %s777_s12 = int_to_ptr.vmem [resolvable:$true] %s776_s12 }
  0x28   :  { %v946_v2 = vld [vmem:[#allocation6] sm:$0xff]   ;;  %873 = vmatprep.subr.bf16.mxu1 %v945_v1  ;;  %v950_v6 = vld [vmem:[#allocation6 + $0x8] sm:$0xff]   ;;  %v953_v9 = vld [vmem:[#allocation6 + $0xd0] sm:$0xff]   ;;  %p1061_p3 = scmp.lt.s32.totalorder %s777_s12, %s777_s12 }
  0x29   :  { %v947_v3 = vld [vmem:[#allocation6 + $0x80] sm:$0xff]   ;;  %852 = vmatpush3.bf16.msra.mxu0 %v946_v2  ;;  %v951_v7 = vld [vmem:[#allocation6 + $0x88] sm:$0xff]   ;;  %v954_v10 = vld [vmem:[#allocation6 + $0x10] sm:$0xff]  }
  0x2a   :  { %874 = vmatpush3.bf16.msra.mxu1 %v947_v3  ;;  %853 = vmatprep.subr.bf16.mxu0 %v948_v4  ;;  %v955_v11 = vld [vmem:[#allocation6 + $0x90] sm:$0xff]   ;;  %v956_v12 = vld [vmem:[#allocation6 + $0x58] sm:$0xff]   ;;  %v960_v16 = vld [vmem:[#allocation6 + $0x60] sm:$0xff]  }
  0x2b   :  { %875 = vmatprep.subr.bf16.mxu1 %v949_v5  ;;  %v957_v13 = vld [vmem:[#allocation6 + $0xd8] sm:$0xff]   ;;  %v961_v17 = vld [vmem:[#allocation6 + $0xe0] sm:$0xff]   ;;  %v964_v20 = vld [vmem:[#allocation6 + $0x68] sm:$0xff]  }
  0x2c   :  { %v958_v14 = vld [vmem:[#allocation6 + $0x18] sm:$0xff]   ;;  %v962_v18 = vld [vmem:[#allocation6 + $0x20] sm:$0xff]   ;;  %v965_v21 = vld [vmem:[#allocation6 + $0xe8] sm:$0xff]  }
  0x2d   :  { %854 = vmatpush3.bf16.msra.mxu0 %v950_v6  ;;  %v959_v15 = vld [vmem:[#allocation6 + $0x98] sm:$0xff]   ;;  %v963_v19 = vld [vmem:[#allocation6 + $0xa0] sm:$0xff]   ;;  %v966_v22 = vld [vmem:[#allocation6 + $0x28] sm:$0xff]  }
  0x2e   :  { %876 = vmatpush3.bf16.msra.mxu1 %v951_v7  ;;  %855 = vmatprep.subr.bf16.mxu0 %v952_v8  ;;  %v967_v23 = vld [vmem:[#allocation6 + $0xa8] sm:$0xff]   ;;  %v968_v24 = vld [vmem:[#allocation6 + $0x70] sm:$0xff]   ;;  %v972_v28 = vld [vmem:[#allocation6 + $0x78] sm:$0xff]  }
  0x2f   :  { %877 = vmatprep.subr.bf16.mxu1 %v953_v9  ;;  %v969_v25 = vld [vmem:[#allocation6 + $0xf0] sm:$0xff]   ;;  %v973_v29 = vld [vmem:[#allocation6 + $0xf8] sm:$0xff]   ;;  %v43_v32 = vld [vmem:[#allocation3 + $0x8] sm:$0xff] }
  0x30   :  { %v970_v26 = vld [vmem:[#allocation6 + $0x30] sm:$0xff]   ;;  %v974_v30 = vld [vmem:[#allocation6 + $0x38] sm:$0xff]   ;;  %v42_v34 = vld [vmem:[#allocation3] sm:$0xff]  ;;  %v51_v35 = vpack.c.bf16 %v43_v32, %v43_v32 }
  0x31   :  { %856 = vmatpush3.bf16.msra.mxu0 %v954_v10  ;;  %v971_v27 = vld [vmem:[#allocation6 + $0xb0] sm:$0xff]   ;;  %v975_v31 = vld [vmem:[#allocation6 + $0xb8] sm:$0xff]   ;;  %v50_v37 = vpack.c.bf16 %v42_v34, %v42_v34  ;;  %v976_v40 = vld [vmem:[#allocation6 + $0x140] sm:$0xff]  }
  0x32   :  { %878 = vmatpush3.bf16.msra.mxu1 %v955_v11  ;;  %857 = vmatprep.subr.bf16.mxu0 %v956_v12  ;;  %v45_v33 = vld [vmem:[#allocation3 + $0x18] sm:$0xff]  ;;  %v44_v38 = vld [vmem:[#allocation3 + $0x10] sm:$0xff]  ;;  %v977_v41 = vld [vmem:[#allocation6 + $0x1c0] sm:$0xff]  }
  0x33   :  { %879 = vmatprep.subr.bf16.mxu1 %v957_v13  ;;  %v53_v36 = vpack.c.bf16 %v45_v33, %v45_v33  ;;  %v52_v39 = vpack.c.bf16 %v44_v38, %v44_v38  ;;  %602 = vmatprep.mubr.bf16.mxu0 %v51_v35  ;;  %v978_v42 = vld [vmem:[#allocation6 + $0x100] sm:$0xff]   ;;  %v980_v44 = vld [vmem:[#allocation6 + $0x148] sm:$0xff]   ;;  %v984_v48 = vld [vmem:[#allocation6 + $0x150] sm:$0xff]  }
  0x34   :  { %v979_v43 = vld [vmem:[#allocation6 + $0x180] sm:$0xff]   ;;  %v981_v45 = vld [vmem:[#allocation6 + $0x1c8] sm:$0xff]   ;;  %v985_v49 = vld [vmem:[#allocation6 + $0x1d0] sm:$0xff]  }
  0x35   :  { %858 = vmatpush3.bf16.msra.mxu0 %v958_v14  ;;  %642 = vmatprep.mubr.bf16.mxu1 %v53_v36  ;;  %v982_v46 = vld [vmem:[#allocation6 + $0x108] sm:$0xff]   ;;  %v986_v50 = vld [vmem:[#allocation6 + $0x110] sm:$0xff]   ;;  %v988_v52 = vld [vmem:[#allocation6 + $0x158] sm:$0xff]  }
  0x36   :  { %880 = vmatpush3.bf16.msra.mxu1 %v959_v15  ;;  %859 = vmatprep.subr.bf16.mxu0 %v960_v16  ;;  %v983_v47 = vld [vmem:[#allocation6 + $0x188] sm:$0xff]   ;;  %v987_v51 = vld [vmem:[#allocation6 + $0x190] sm:$0xff]   ;;  %v989_v53 = vld [vmem:[#allocation6 + $0x1d8] sm:$0xff]  }
  0x37   :  { %881 = vmatprep.subr.bf16.mxu1 %v961_v17  ;;  %v990_v54 = vld [vmem:[#allocation6 + $0x118] sm:$0xff]   ;;  %v992_v56 = vld [vmem:[#allocation6 + $0x160] sm:$0xff]   ;;  %v996_v60 = vld [vmem:[#allocation6 + $0x168] sm:$0xff]  }
  0x38   :  { %v991_v55 = vld [vmem:[#allocation6 + $0x198] sm:$0xff]   ;;  %v993_v57 = vld [vmem:[#allocation6 + $0x1e0] sm:$0xff]   ;;  %v997_v61 = vld [vmem:[#allocation6 + $0x1e8] sm:$0xff]  }
  0x39   :  { %860 = vmatpush3.bf16.msra.mxu0 %v962_v18  ;;  %v994_v58 = vld [vmem:[#allocation6 + $0x120] sm:$0xff]   ;;  %v998_v62 = vld [vmem:[#allocation6 + $0x128] sm:$0xff]   ;;  %v1000_v0 = vld [vmem:[#allocation6 + $0x170] sm:$0xff]  }
  0x3a   :  { %882 = vmatpush3.bf16.msra.mxu1 %v963_v19  ;;  %861 = vmatprep.subr.bf16.mxu0 %v964_v20  ;;  %v995_v59 = vld [vmem:[#allocation6 + $0x1a0] sm:$0xff]   ;;  %v999_v63 = vld [vmem:[#allocation6 + $0x1a8] sm:$0xff]   ;;  %v1001_v1 = vld [vmem:[#allocation6 + $0x1f0] sm:$0xff]  }
  0x3b   :  { %883 = vmatprep.subr.bf16.mxu1 %v965_v21  ;;  %v1002_v2 = vld [vmem:[#allocation6 + $0x130] sm:$0xff]   ;;  %v1004_v4 = vld [vmem:[#allocation6 + $0x178] sm:$0xff]   ;;  %v47_v8 = vld [vmem:[#allocation3 + $0x28] sm:$0xff] }
  0x3c   :  { %v1003_v3 = vld [vmem:[#allocation6 + $0x1b0] sm:$0xff]   ;;  %v1005_v5 = vld [vmem:[#allocation6 + $0x1f8] sm:$0xff]   ;;  %v55_v10 = vpack.c.bf16 %v47_v8, %v47_v8  ;;  %v46_v12 = vld [vmem:[#allocation3 + $0x20] sm:$0xff] }
  0x3d   :  { %862 = vmatpush3.bf16.msra.mxu0 %v966_v22  ;;  %v1006_v6 = vld [vmem:[#allocation6 + $0x138] sm:$0xff]   ;;  %v48_v13 = vld [vmem:[#allocation3 + $0x30] sm:$0xff]  ;;  %v54_v14 = vpack.c.bf16 %v46_v12, %v46_v12  ;;  %v850_v38 = vld [vmem:[%s1157_s2] ss:$0 sm:$0xff]  ;;  %s1056_s2 = scalar_lea.vmem %s777_s12, 128 }
  0x3e   :  { %884 = vmatpush3.bf16.msra.mxu1 %v967_v23  ;;  %863 = vmatprep.subr.bf16.mxu0 %v968_v24  ;;  %v1007_v7 = vld [vmem:[#allocation6 + $0x1b8] sm:$0xff]   ;;  %v56_v15 = vpack.c.bf16 %v48_v13, %v48_v13  ;;  %p1057_p2 = scmp.ne.s32.totalorder %s777_s12, %s1056_s2  ;;  %p1062_p4 = scmp.lt.s32.totalorder %s1056_s2, %s1056_s2 }
  0x3f   :  { %885 = vmatprep.subr.bf16.mxu1 %v969_v25  ;;  %v49_v9 = vld [vmem:[#allocation3 + $0x38] sm:$0xff] }
  0x40   :  { %v57_v11 = vpack.c.bf16 %v49_v9, %v49_v9  ;;  %p1063_p5 = por %p1062_p4, %p1061_p3 }
  0x41   :  { %864 = vmatpush3.bf16.msra.mxu0 %v970_v26 }
  0x42   :  { %886 = vmatpush3.bf16.msra.mxu1 %v971_v27  ;;  %865 = vmatprep.subr.bf16.mxu0 %v972_v28  ;;  %p1064_p6 = pnand %p1063_p5, %p1057_p2 }
  0x43   :  { %887 = vmatprep.subr.bf16.mxu1 %v973_v29 }
  0x45   :  { %866 = vmatpush3.bf16.msra.mxu0 %v974_v30 }
  0x46   :  { %888 = vmatpush3.bf16.msra.mxu1 %v975_v31  ;;  %895 = vmatprep.subr.bf16.mxu0 %v976_v40 }
  0x47   :  { %917 = vmatprep.subr.bf16.mxu1 %v977_v41 }
  0x48   :  { %603 = vmatmul.mubr.bf16.vlgmr.msra.gmra.mrb[0].mxu0 %v50_v37 }
  0x49   :  { %643 = vmatmul.mubr.bf16.vlgmr.msra.gmra.mrb[0].mxu1 %v52_v39  ;;  %896 = vmatpush3.bf16.msra.mxu0 %v978_v42 }
  0x4a   :  { %918 = vmatpush3.bf16.msra.mxu1 %v979_v43  ;;  %897 = vmatprep.subr.bf16.mxu0 %v980_v44 }
  0x4b   :  { %919 = vmatprep.subr.bf16.mxu1 %v981_v45  ;;  %682 = vmatprep.mubr.bf16.mxu0 %v55_v10 }
  0x4c   :  { %722 = vmatprep.mubr.bf16.mxu1 %v57_v11 }
  0x4d   :  { %898 = vmatpush3.bf16.msra.mxu0 %v982_v46  ;;  %v764_v46 = vlaneseq }
  0x4e   :  { %920 = vmatpush3.bf16.msra.mxu1 %v983_v47  ;;  %899 = vmatprep.subr.bf16.mxu0 %v984_v48 }
  0x4f   :  { %921 = vmatprep.subr.bf16.mxu1 %v985_v49  ;;  %v765_v48 = vand.u32 127, %v764_v46 }
  0x51   :  { %900 = vmatpush3.bf16.msra.mxu0 %v986_v50  ;;  %vm766_vm0 = vcmp.eq.s32.totalorder %v765_v48, 10 }
  0x52   :  { %922 = vmatpush3.bf16.msra.mxu1 %v987_v51  ;;  %901 = vmatprep.subr.bf16.mxu0 %v988_v52 }
  0x53   :  { %923 = vmatprep.subr.bf16.mxu1 %v989_v53 }
  0x55   :  { %902 = vmatpush3.bf16.msra.mxu0 %v990_v54 }
  0x56   :  { %924 = vmatpush3.bf16.msra.mxu1 %v991_v55  ;;  %903 = vmatprep.subr.bf16.mxu0 %v992_v56 }
  0x57   :  { %925 = vmatprep.subr.bf16.mxu1 %v993_v57 }
  0x59   :  { %904 = vmatpush3.bf16.msra.mxu0 %v994_v58 }
  0x5a   :  { %926 = vmatpush3.bf16.msra.mxu1 %v995_v59  ;;  %905 = vmatprep.subr.bf16.mxu0 %v996_v60 }
  0x5b   :  { %927 = vmatprep.subr.bf16.mxu1 %v997_v61 }
  0x5d   :  { %906 = vmatpush3.bf16.msra.mxu0 %v998_v62 }
  0x5e   :  { %928 = vmatpush3.bf16.msra.mxu1 %v999_v63  ;;  %907 = vmatprep.subr.bf16.mxu0 %v1000_v0 }
  0x5f   :  { %929 = vmatprep.subr.bf16.mxu1 %v1001_v1 }
  0x61   :  { %908 = vmatpush3.bf16.msra.mxu0 %v1002_v2 }
  0x62   :  { %930 = vmatpush3.bf16.msra.mxu1 %v1003_v3  ;;  %909 = vmatprep.subr.bf16.mxu0 %v1004_v4 }
  0x63   :  { %931 = vmatprep.subr.bf16.mxu1 %v1005_v5 }
  0x65   :  { %910 = vmatpush3.bf16.msra.mxu0 %v1006_v6 }
  0x66   :  { %932 = vmatpush3.bf16.msra.mxu1 %v1007_v7 }
  0x68   :  { %683 = vmatmul.mubr.bf16.vlgmr.msra.gmra.mrb[4].mxu0 %v54_v14 }
  0x69   :  { %723 = vmatmul.mubr.bf16.vlgmr.msra.gmra.mrb[4].mxu1 %v56_v15 }
 0x11b   :  { %v867_v16 = vpop.f32.mrb[0].mxu0 }
 0x11c   :  { %v889_v17 = vpop.f32.mrb[0].mxu1  ;;  %v868_v18 = vpop.f32.mrb[1].mxu0 }
 0x11d   :  { %v890_v19 = vpop.f32.mrb[1].mxu1  ;;  %v869_v20 = vadd.f32 %v868_v18, %v867_v16  ;;  %v870_v22 = vpop.f32.mrb[2].mxu0 }
 0x11e   :  { %v891_v21 = vadd.f32 %v890_v19, %v889_v17  ;;  %v892_v23 = vpop.f32.mrb[2].mxu1  ;;  %v871_v24 = vpop.f32.mrb[3].mxu0 }
 0x11f   :  { %v893_v25 = vpop.f32.mrb[3].mxu1 }
 0x120   :  { %v645_v26 = vadd.f32 %v891_v21, %v869_v20 }
 0x13b   :  { %v911_v27 = vpop.f32.mrb[4].mxu0 }
 0x13c   :  { %v933_v28 = vpop.f32.mrb[4].mxu1  ;;  %v912_v29 = vpop.f32.mrb[5].mxu0 }
 0x13d   :  { %v913_v30 = vadd.f32 %v912_v29, %v911_v27  ;;  %v934_v31 = vpop.f32.mrb[5].mxu1  ;;  %v914_v32 = vpop.f32.mrb[6].mxu0 }
 0x13e   :  { %v935_v33 = vadd.f32 %v934_v31, %v933_v28  ;;  %v936_v34 = vpop.f32.mrb[6].mxu1  ;;  %v915_v35 = vpop.f32.mrb[7].mxu0 }
 0x13f   :  { %v685_v36 = vadd.f32 %v913_v30, %v645_v26  ;;  %v937_v37 = vpop.f32.mrb[7].mxu1 }
 0x141   :  { %v725_v39 = vadd.f32 %v935_v33, %v685_v36 }
 0x143   :  { %v753_v40 = vadd.f32 %v850_v38, %v725_v39 }
 0x145   :  { %754 = vmax.xlane.f32.xlu0 %v753_v40 }
 0x1d2   :  { %v755_v41 = vpop.xlane.xlu0 %754 }
 0x1d3   :  { %v756_v42 = vsub.f32 %v753_v40, %v755_v41 }
 0x1d5   :  { %v757_v43 = vmul.f32 1.442695, %v756_v42 }
 0x1d7   :  { %1008 = vpow2.f32 %v757_v43 }
 0x1e1   :  { %v1009_v44 = vpop.eup %1008 }
 0x1e2   :  { %759 = vadd.xlane.f32.xlu0 %v1009_v44 }
 0x26f   :  { %v760_v45 = vpop.xlane.xlu0 %759 }
 0x270   :  { %1010 = vlog2.f32 %v760_v45 }
 0x27a   :  { %v1011_v47 = vpop.eup %1010 }
 0x27b   :  { %v762_v49 = vmul.f32 0.6931472, %v1011_v47 }
 0x27d   :  { %v763_v50 = vadd.f32 %v762_v49, %v755_v41 }
 0x27f   :  { %v767_v51 = vsub.f32 0.0, %v763_v50 }
 0x281   :  { %v768_v52 = vsel %vm766_vm0, %v767_v51, %v753_v40 }
 0x282   :  { %769 = vst [vmem:[#allocation8] sm:$0xff] %v768_v52 }
 0x283   :  { %1067 = shalt.err (!%p1064_p6)
}
 0x284   :  { %s1068_s15 = scalar_lea.hbm %s1158_s3, 128 }
 0x285   :  { %p1069_p7 = scmp.ne.s32.totalorder %s1158_s3, %s1068_s15  ;;  %p1072_p8 = scmp.lt.u32.totalorder %s1068_s15, %s1158_s3 }
 0x287   :  { %p1074_p9 = pnand %p1072_p8, %p1069_p7 }
 0x289   :  { %1077 = shalt.err (!%p1074_p9)
}
 0x28a   :  { %779 = dma.vmem_to_hbm [thread:$0]  %s777_s12, 128, %s1158_s3, [#allocation5]  }
 0x28b   :  { %1082 = dma.done.wait [#allocation5], 128  }
 0x28c   :  { %1083 = vsyncadd [#allocation5], 4294967168 }
 0x28d   :  { %783 = vsyncpa [#allocation4], 1 }
 0x28e   :  { %784 = vsyncpa [#allocation7], 1 }
 0x28f   :  { %785 = vsyncpa [#allocation5], 1 }

</bundles_post_ra>
